<compile_context>
chip_gen: v7x
topology: tpu7x:2x2x1
jax: 0.10.0
libtpu: 0.0.40
codegen_flags: <defaults>
</compile_context>

<pallas_src>
import functools
import math

import jax
import jax.numpy as jnp
from jax.experimental import pallas as pl
from jax.experimental.pallas import tpu as pltpu

_LANE = 128
_ROW_ALIGN = 16                 # sublane alignment safe for both f32 and bf16
_TARGET_BLOCK_BYTES = 2 << 20   # ~2 MiB per output block


def _round_up(x: int, m: int) -> int:
    return ((x + m - 1) // m) * m


def _pick_rows(n_rows: int, width: int, itemsize: int) -> int:
    """Seq-tile rows per grid step.

    Targets ~2 MiB per output block (so writeback dwarfs the ~0.35 us
    per-grid-step overhead), clamps to [512, 4096], keeps >= 2 grid steps when
    there is enough work (v7x dual-TensorCore 'parallel' axis), and falls back
    to a single full-extent block for small sequences (always layout-legal).
    """
    rows = _TARGET_BLOCK_BYTES // max(1, width * itemsize)
    rows = max(512, min(4096, rows))
    if n_rows > 1024:
        rows = min(rows, _round_up(-(-n_rows // 2), _ROW_ALIGN))
    rows = _round_up(rows, _ROW_ALIGN)
    if rows >= n_rows:
        return n_rows
    return rows


# ---------------------------------------------------------------------------
# Kernels
# ---------------------------------------------------------------------------
def _rope_half_kernel(inv_half_ref, cos_ref, sin_ref, *, rows_per_block):
    """Path for dim % 256 == 0.

    half = dim // 2 is a multiple of 128, so the (rows, half) angle slab uses
    every lane; cos/sin are computed once on the unique half of the rotary
    features (the cat(freqs, freqs) layout duplicates them) and written with
    two lane-aligned unmasked stores -- no in-kernel concatenate.
    """
    half = inv_half_ref.shape[-1]
    base = pl.program_id(0) * rows_per_block
    row = jax.lax.broadcasted_iota(jnp.int32, (rows_per_block, half), 0)
    pos = (base + row).astype(jnp.float32)
    ang = pos * inv_half_ref[...]                  # (1, half) broadcast
    c = jnp.cos(ang).astype(cos_ref.dtype)
    s = jnp.sin(ang).astype(sin_ref.dtype)
    cos_ref[:, :half] = c
    cos_ref[:, half:] = c
    sin_ref[:, :half] = s
    sin_ref[:, half:] = s


def _rope_full_kernel(scaled_inv_ref, phase_ref, cos_ref, sin_ref, *,
                      rows_per_block, add_phase):
    """Full-width / packed path.

    ang = packed_row * (pack * inv) + off * inv, with the `* pack` and `+ off`
    folded into the host-precomputed per-lane constants scaled_inv / phase.
    For pack == 1 (dim a multiple of 128 but not 256) the phase add is skipped.
    """
    w = scaled_inv_ref.shape[-1]
    base = pl.program_id(0) * rows_per_block
    row = jax.lax.broadcasted_iota(jnp.int32, (rows_per_block, w), 0)
    prow = (base + row).astype(jnp.float32)
    ang = prow * scaled_inv_ref[...]
    if add_phase:
        ang = ang + phase_ref[...]
    cos_ref[...] = jnp.cos(ang).astype(cos_ref.dtype)
    sin_ref[...] = jnp.sin(ang).astype(sin_ref.dtype)


# ---------------------------------------------------------------------------
# Cache builder
# ---------------------------------------------------------------------------
@functools.partial(jax.jit, static_argnames=("seq_len", "dim", "out_dtype"))
def _compute_cos_sin_cache(inv_freq, seq_len, dim, out_dtype):
    out_dtype = jnp.dtype(out_dtype)
    itemsize = out_dtype.itemsize
    half = dim // 2
    cparams = pltpu.CompilerParams(dimension_semantics=("parallel",))

    if dim % 256 == 0:
        # Half-angle EUP path: half is a multiple of 128, every lane live.
        rows = _pick_rows(seq_len, dim, itemsize)
        grid = (pl.cdiv(seq_len, rows),)
        inv_half = inv_freq.astype(jnp.float32).reshape(1, half)
        cos, sin = pl.pallas_call(
            functools.partial(_rope_half_kernel, rows_per_block=rows),
            out_shape=(
                jax.ShapeDtypeStruct((seq_len, dim), out_dtype),
                jax.ShapeDtypeStruct((seq_len, dim), out_dtype),
            ),
            grid=grid,
            in_specs=[pl.BlockSpec((1, half), lambda i: (0, 0))],
            out_specs=(
                pl.BlockSpec((rows, dim), lambda i: (i, 0)),
                pl.BlockSpec((rows, dim), lambda i: (i, 0)),
            ),
            compiler_params=cparams,
        )(inv_half)
        return cos, sin

    # Full-width path.  pack == 1 when dim % 128 == 0 (e.g. dim=128); otherwise
    # `pack` consecutive positions are packed into one lane-dense row of width
    # pack*dim (a multiple of 128) so output stores are never masked vst.msk.
    pack = _LANE // math.gcd(dim, _LANE)
    width = pack * dim
    n_rows = -(-seq_len // pack)                   # ceil(seq_len / pack)
    rows = _pick_rows(n_rows, width, itemsize)
    grid = (pl.cdiv(n_rows, rows),)

    inv_full = jnp.concatenate([inv_freq, inv_freq], axis=0).astype(jnp.float32)
    inv_tiled = jnp.tile(inv_full, pack).reshape(1, width)
    scaled_inv = inv_tiled * float(pack)
    off = jnp.repeat(jnp.arange(pack, dtype=jnp.float32), dim).reshape(1, width)
    phase = off * inv_tiled

    cos, sin = pl.pallas_call(
        functools.partial(_rope_full_kernel, rows_per_block=rows,
                          add_phase=(pack > 1)),
        out_shape=(
            jax.ShapeDtypeStruct((n_rows, width), out_dtype),
            jax.ShapeDtypeStruct((n_rows, width), out_dtype),
        ),
        grid=grid,
        in_specs=[
            pl.BlockSpec((1, width), lambda i: (0, 0)),
            pl.BlockSpec((1, width), lambda i: (0, 0)),
        ],
        out_specs=(
            pl.BlockSpec((rows, width), lambda i: (i, 0)),
            pl.BlockSpec((rows, width), lambda i: (i, 0)),
        ),
        compiler_params=cparams,
    )(scaled_inv, phase)

    if pack == 1:
        return cos, sin
    # TODO(synk): the minor-dim reshape forces a relayout copy + one more slice
    # pass; acceptable because dim<128 caches are tiny.
    return (cos.reshape(n_rows * pack, dim)[:seq_len],
            sin.reshape(n_rows * pack, dim)[:seq_len])


# ---------------------------------------------------------------------------
# Module
# ---------------------------------------------------------------------------
class RotaryEmbeddings:
    """JAX/Pallas port of the PyTorch RotaryEmbeddings module.

    * Per-dtype caches are generated directly by the kernel in the consumer
      dtype (no whole-cache HBM astype pass); each dtype's cache is computed
      from scratch, so an f32 caller never sees bf16-rounded values even after
      a bf16-triggered rebuild.
    * Sliced (dtype, seq_len) views are memoized, so steady-state forward
      calls dispatch no device work.
    * Positions/angles are f32, exact up to ~2^24 -- same as the f32 torch
      reference.
    """

    def __init__(self, dim: int, max_seq_len: int, theta: float = 10000.0,
                 cache_dtype=jnp.float32):
        if dim % 2 != 0:
            raise ValueError(f"RotaryEmbeddings requires an even dim, got {dim}")
        self.dim = dim
        self.max_seq_len = max_seq_len
        self.theta = theta
        # inv_freq = 1 / theta ** (arange(0, dim, 2) / dim), shape (dim//2,)
        self.inv_freq = 1.0 / (
            theta ** (jnp.arange(0, dim, 2, dtype=jnp.float32) / dim)
        )
        self._cached_seq_len = 0
        self._full_cache = {}    # dtype -> (cos, sin) at _cached_seq_len
        self._slice_cache = {}   # (dtype, seq_len) -> (cos, sin) views
        self._grow(max_seq_len, jnp.dtype(cache_dtype))

    # --- cache management -------------------------------------------------
    def _grow(self, seq_len: int, dtype):
        self._cached_seq_len = max(int(seq_len), self._cached_seq_len)
        self._full_cache = {}
        self._slice_cache = {}
        cos, sin = self._full_for_dtype(dtype)
        # Buffer attributes for API parity with the PyTorch module.
        self.cos_cache = cos
        self.sin_cache = sin

    def _full_for_dtype(self, dtype):
        dtype = jnp.dtype(dtype)
        if dtype not in self._full_cache:
            self._full_cache[dtype] = _compute_cos_sin_cache(
                self.inv_freq, self._cached_seq_len, self.dim, dtype)
        return self._full_cache[dtype]

    # Kept for API parity with the PyTorch module.
    def _set_cos_sin_cache(self, seq_len: int, dtype=jnp.float32):
        self._grow(seq_len, jnp.dtype(dtype))

    # --- forward ------------------------------------------------------------
    def __call__(self, x, seq_len=None):
        if seq_len is None:
            seq_len = x.shape[1]
        dt = jnp.dtype(x.dtype)
        if seq_len > self._cached_seq_len:
            self._grow(seq_len, dt)
        key = (dt, seq_len)
        if key not in self._slice_cache:
            cos, sin = self._full_for_dtype(dt)
            if seq_len != self._cached_seq_len:
                cos, sin = cos[:seq_len], sin[:seq_len]
            self._slice_cache[key] = (cos, sin)
        return self._slice_cache[key]


# ---------------------------------------------------------------------------
# Demo / correctness check
# ---------------------------------------------------------------------------
if __name__ == "__main__":
    def _reference(dim, seq_len, theta, dtype):
        inv = 1.0 / (theta ** (jnp.arange(0, dim, 2, dtype=jnp.float32) / dim))
        t = jnp.arange(seq_len, dtype=jnp.float32)
        freqs = jnp.einsum("i,j->ij", t, inv)
        emb = jnp.concatenate([freqs, freqs], axis=-1)
        return jnp.cos(emb).astype(dtype), jnp.sin(emb).astype(dtype)

    key = jax.random.PRNGKey(0)

    # Case 1: small head dim (dim < 128 -> packed lane-dense path), f32.
    dim, max_seq_len, batch, seq, heads = 32, 16, 2, 8, 4
    x = jax.random.normal(key, (batch, seq, heads, dim), dtype=jnp.float32)
    rope = RotaryEmbeddings(dim=dim, max_seq_len=max_seq_len, theta=10000.0)
    cos, sin = rope(x)
    cos = jax.block_until_ready(cos)
    sin = jax.block_until_ready(sin)
    ref_cos, ref_sin = _reference(dim, seq, 10000.0, jnp.float32)
    assert cos.shape == (seq, dim) and sin.shape == (seq, dim)
    assert cos.dtype == x.dtype and sin.dtype == x.dtype
    assert jnp.allclose(cos, ref_cos, atol=1e-5, rtol=1e-5)
    assert jnp.allclose(sin, ref_sin, atol=1e-5, rtol=1e-5)

    # Case 1b: seq_len longer than the cached max -> cache rebuild/grow path.
    x_long = jax.random.normal(key, (batch, 20, heads, dim), dtype=jnp.float32)
    cos_l, sin_l = rope(x_long)
    cos_l = jax.block_until_ready(cos_l)
    sin_l = jax.block_until_ready(sin_l)
    ref_cos_l, ref_sin_l = _reference(dim, 20, 10000.0, jnp.float32)
    assert cos_l.shape == (20, dim) and sin_l.shape == (20, dim)
    assert jnp.allclose(cos_l, ref_cos_l, atol=1e-5, rtol=1e-5)
    assert jnp.allclose(sin_l, ref_sin_l, atol=1e-5, rtol=1e-5)

    # Case 2: dim = 128 (full-width path, pack == 1), bf16 consumer; the cache
    # is generated by the kernel directly in bf16 (no f32->bf16 HBM pass).
    dim2, max_seq2, seq2 = 128, 64, 48
    x2 = jax.random.normal(jax.random.PRNGKey(1), (1, seq2, 2, dim2),
                           dtype=jnp.bfloat16)
    rope2 = RotaryEmbeddings(dim=dim2, max_seq_len=max_seq2, theta=10000.0)
    cos2, sin2 = rope2(x2)
    cos2 = jax.block_until_ready(cos2)
    sin2 = jax.block_until_ready(sin2)
    ref_cos2, ref_sin2 = _reference(dim2, seq2, 10000.0, jnp.float32)
    assert cos2.shape == (seq2, dim2) and sin2.shape == (seq2, dim2)
    assert cos2.dtype == jnp.bfloat16 and sin2.dtype == jnp.bfloat16
    assert jnp.allclose(cos2.astype(jnp.float32), ref_cos2, atol=2e-2, rtol=2e-2)
    assert jnp.allclose(sin2.astype(jnp.float32), ref_sin2, atol=2e-2, rtol=2e-2)

    # Case 3: dim multiple of 256 -> half-angle EUP path (lane-full halves,
    # two aligned stores, no in-kernel concat), f32.
    dim3, max_seq3, seq3 = 256, 40, 24
    x3 = jax.random.normal(jax.random.PRNGKey(2), (1, seq3, 2, dim3),
                           dtype=jnp.float32)
    rope3 = RotaryEmbeddings(dim=dim3, max_seq_len=max_seq3, theta=10000.0)
    cos3, sin3 = rope3(x3)
    cos3 = jax.block_until_ready(cos3)
    sin3 = jax.block_until_ready(sin3)
    ref_cos3, ref_sin3 = _reference(dim3, seq3, 10000.0, jnp.float32)
    assert cos3.shape == (seq3, dim3) and sin3.shape == (seq3, dim3)
    assert jnp.allclose(cos3, ref_cos3, atol=1e-5, rtol=1e-5)
    assert jnp.allclose(sin3, ref_sin3, atol=1e-5, rtol=1e-5)

    print("KERNEL_OK")
</pallas_src>

<mosaic_0001>
module attributes {stable_mosaic.version = 11 : i64} {
  func.func @_rope_full_kernel(%arg0: i32, %arg1: memref<1x128xf32, #tpu.memory_space<vmem>>, %arg2: memref<1x128xf32, #tpu.memory_space<vmem>>, %arg3: memref<4x128xf32, #tpu.memory_space<vmem>>, %arg4: memref<4x128xf32, #tpu.memory_space<vmem>>) attributes {dimension_semantics = [#tpu.dimension_semantics<parallel>], iteration_bounds = array<i64: 1>, scalar_prefetch = 0 : i64, scratch_operands = 0 : i64, tpu.core_type = #tpu.core_type<tc>, window_params = [{pipeline_mode = #tpu.pipeline_mode<synchronous>, transform_indices = @transform_0, window_bounds = array<i64: 1, 128>}, {pipeline_mode = #tpu.pipeline_mode<synchronous>, transform_indices = @transform_1, window_bounds = array<i64: 1, 128>}, {transform_indices = @transform_2, window_bounds = array<i64: 4, 128>}, {transform_indices = @transform_3, window_bounds = array<i64: 4, 128>}]} {
    %c4_i32 = arith.constant 4 : i32
    %0 = arith.muli %arg0, %c4_i32 : i32
    %1 = tpu.iota {dimensions = array<i32: 0>} : vector<4x128xi32>
    %2 = vector.broadcast %0 : i32 to vector<4x128xi32>
    %3 = arith.addi %2, %1 : vector<4x128xi32>
    %4 = arith.sitofp %3 : vector<4x128xi32> to vector<4x128xf32>
    %c0 = arith.constant 0 : index
    %c0_0 = arith.constant 0 : index
    %5 = vector.load %arg1[%c0, %c0_0] : memref<1x128xf32, #tpu.memory_space<vmem>>, vector<1x128xf32>
    %6 = vector.broadcast %5 : vector<1x128xf32> to vector<4x128xf32>
    %7 = arith.mulf %4, %6 : vector<4x128xf32>
    %c0_1 = arith.constant 0 : index
    %c0_2 = arith.constant 0 : index
    %8 = vector.load %arg2[%c0_1, %c0_2] : memref<1x128xf32, #tpu.memory_space<vmem>>, vector<1x128xf32>
    %9 = vector.broadcast %8 : vector<1x128xf32> to vector<4x128xf32>
    %10 = arith.addf %7, %9 : vector<4x128xf32>
    %11 = math.cos %10 : vector<4x128xf32>
    %c0_3 = arith.constant 0 : index
    %c0_4 = arith.constant 0 : index
    %12 = vector.load %arg3[%c0_3, %c0_4] : memref<4x128xf32, #tpu.memory_space<vmem>>, vector<4x128xf32>
    tpu.vector_store %arg3[%c0_3, %c0_4], %11 {strides = array<i32>} : memref<4x128xf32, #tpu.memory_space<vmem>>, vector<4x128xf32>,
    %13 = math.sin %10 : vector<4x128xf32>
    %c0_5 = arith.constant 0 : index
    %c0_6 = arith.constant 0 : index
    %14 = vector.load %arg4[%c0_5, %c0_6] : memref<4x128xf32, #tpu.memory_space<vmem>>, vector<4x128xf32>
    tpu.vector_store %arg4[%c0_5, %c0_6], %13 {strides = array<i32>} : memref<4x128xf32, #tpu.memory_space<vmem>>, vector<4x128xf32>,
    return
  }
  func.func @transform_0(%arg0: i32) -> (i32, i32) {
    %c0_i32 = arith.constant 0 : i32
    %c0_i32_0 = arith.constant 0 : i32
    %c0_i32_1 = arith.constant 0 : i32
    return %c0_i32, %c0_i32_0 : i32, i32
  }
  func.func @transform_1(%arg0: i32) -> (i32, i32) {
    %c0_i32 = arith.constant 0 : i32
    %c0_i32_0 = arith.constant 0 : i32
    %c0_i32_1 = arith.constant 0 : i32
    return %c0_i32, %c0_i32_0 : i32, i32
  }
  func.func @transform_2(%arg0: i32) -> (i32, i32) {
    %c0_i32 = arith.constant 0 : i32
    %c0_i32_0 = arith.constant 0 : i32
    return %arg0, %c0_i32 : i32, i32
  }
  func.func @transform_3(%arg0: i32) -> (i32, i32) {
    %c0_i32 = arith.constant 0 : i32
    %c0_i32_0 = arith.constant 0 : i32
    return %arg0, %c0_i32 : i32, i32
  }
}

</mosaic_0001>

<bundles_post_ra>
// kernel: _compute_cos_sin_cache.1
= control target key start
LH: loop header
LB: loop body
LE: loop exit
PB: predicated region body
PF: predicated region fallthrough
CT: control target
= control target key end

     0   :  { %v14_v0 = vlaneseq  ;;  %v276_v18 = vmov 683565275   ;;  %v277_v20 = vmov 2475754826   ;;  %v278_v22 = vmov 2131351028   ;;  %s335_s0 = inlined_call_operand.vmem [shape: f32[1,128], index: 0, kind: input, shape index: {}]   ;;  %s336_s1 = inlined_call_operand.vmem [shape: f32[1,128], index: 1, kind: input, shape index: {}]   ;;  %s337_s2 = inlined_call_operand.vmem [shape: f32[4,128], index: 2, kind: output, shape index: {0}]   ;;  %s338_s3 = inlined_call_operand.vmem [shape: f32[4,128], index: 3, kind: output, shape index: {1}]  }
   0x1   :  { %v252_v2 = vld [vmem:[%s335_s0] ss:$0 sm:$0xff]  ;;  %v279_v24 = vmov 2102212464   ;;  %v280_v26 = vmov 920167782  }
   0x2   :  { %v15_v1 = vshrl.u32 %v14_v0, 7  ;;  %v253_v4 = vld [vmem:[%s336_s1] ss:$0 sm:$0xff]  ;;  %v281_v33 = vmov 1326507024  }
   0x4   :  { %v18_v3 = vcvt.s32.f32 %v15_v1 }
   0x6   :  { %v26_v5 = vmul.f32 %v252_v2, %v18_v3 }
   0x8   :  { %v308_v6 = vadd.f32 %v253_v4, %v26_v5 }
   0xa   :  { %v38_v7 = vand.u32 2139095040, %v308_v6  ;;  %v35_v9 = vand.u32 2147483647, %v308_v6  ;;  %vm37_vm7 = vcmp.lt.s32.totalorder %v308_v6, 0  ;;  %vm127_vm15 = vweird.f32 %v308_v6 }
   0xc   :  { %v39_v8 = vshrl.u32 %v38_v7, 23  ;;  %v42_v12 = vand.u32 8388607, %v35_v9  ;;  %vm36_vm8 = vcmp.le.f32.partialorder %v35_v9, 0.7853982 }
   0xe   :  { %v254_v10 = vadd.s32 4294967169, %v39_v8  ;;  %v43_v15 = vor.u32 8388608, %v42_v12 }
  0x10   :  { %v45_v11 = vadd.s32 1, %v254_v10  ;;  %v83_v35 = vshll.u32 %v43_v15, 8 }
  0x12   :  { %vm46_vm0 = vcmp.gt.s32.totalorder %v45_v11, 0 }
  0x13   :  { %v47_v13 = vsel %vm46_vm0, %v45_v11, 0 }
  0x14   :  { %v49_v14 = vand.u32 31, %v47_v13  ;;  %v48_v16 = vshrl.u32 %v47_v13, 5 }
  0x16   :  { %v50_v17 = vsub.s32 32, %v49_v14  ;;  %v52_v19 = vshll.u32 %v276_v18, %v49_v14  ;;  %v55_v21 = vshll.u32 %v277_v20, %v49_v14  ;;  %v58_v23 = vshll.u32 %v278_v22, %v49_v14 }
  0x17   :  { %v61_v25 = vshll.u32 %v279_v24, %v49_v14  ;;  %v64_v27 = vshll.u32 %v280_v26, %v49_v14  ;;  %vm67_vm1 = vcmp.lt.s32.totalorder %v48_v16, 1  ;;  %vm70_vm2 = vcmp.lt.s32.totalorder %v48_v16, 4 }
  0x18   :  { %v51_v28 = vshrl.u32 %v276_v18, %v50_v17  ;;  %v53_v29 = vshrl.u32 %v277_v20, %v50_v17  ;;  %v56_v30 = vshrl.u32 %v278_v22, %v50_v17  ;;  %v59_v31 = vshrl.u32 %v279_v24, %v50_v17 }
  0x19   :  { %v62_v32 = vshrl.u32 %v280_v26, %v50_v17  ;;  %v65_v34 = vshrl.u32 %v281_v33, %v50_v17  ;;  %vm68_vm3 = vcmp.lt.s32.totalorder %v48_v16, 2  ;;  %vm69_vm4 = vcmp.lt.s32.totalorder %v48_v16, 3 }
  0x1a   :  { %v54_v36 = vor.u32 %v53_v29, %v52_v19  ;;  %v57_v37 = vor.u32 %v56_v30, %v55_v21  ;;  %v60_v38 = vor.u32 %v59_v31, %v58_v23 }
  0x1b   :  { %v63_v39 = vor.u32 %v62_v32, %v61_v25  ;;  %v66_v40 = vor.u32 %v65_v34, %v64_v27 }
  0x1c   :  { %v71_v41 = vsel %vm67_vm1, %v51_v28, %v54_v36  ;;  %v72_v42 = vsel %vm70_vm2, %v60_v38, 2102212464  ;;  %v75_v43 = vsel %vm67_vm1, %v54_v36, %v57_v37  ;;  %v79_v44 = vsel %vm67_vm1, %v57_v37, %v60_v38 }
  0x1d   :  { %v73_v45 = vsel %vm69_vm4, %v57_v37, %v72_v42  ;;  %v76_v46 = vsel %vm70_vm2, %v63_v39, 920167782  ;;  %v80_v47 = vsel %vm70_vm2, %v66_v40, 1326507024 }
  0x1e   :  { %v77_v48 = vsel %vm69_vm4, %v60_v38, %v76_v46  ;;  %v81_v49 = vsel %vm69_vm4, %v63_v39, %v80_v47  ;;  %v74_v50 = vsel %vm68_vm3, %v71_v41, %v73_v45 }
  0x1f   :  { %v78_v51 = vsel %vm68_vm3, %v75_v43, %v77_v48  ;;  %v82_v52 = vsel %vm68_vm3, %v79_v44, %v81_v49  ;;  %v90_v57 = vmul.u32 %v83_v35, %v74_v50 }
  0x20   :  { %v314_v53 = vmul.u32.u64.low %v83_v35, %v82_v52  ;;  %v315_v54 = vmul.u32.u64.high %v83_v35, %v82_v52, %v314_v53  ;;  %v317_v55 = vmul.u32.u64.low %v83_v35, %v78_v51  ;;  %v318_v56 = vmul.u32.u64.high %v83_v35, %v78_v51, %v317_v55 }
  0x22   :  { %vm92_vm5 = vc.u32 %v315_v54, %v317_v55  ;;  %v93_v58 = vadd.s32 1, %v318_v56  ;;  %v91_v5 = vadd.s32 %v317_v55, %v315_v54 }
  0x24   :  { %v94_v59 = vsel %vm92_vm5, %v93_v58, %v318_v56 }
  0x25   :  { %v95_v60 = vadd.s32 %v94_v59, %v90_v57 }
  0x27   :  { %v96_v61 = vadd.s32 536870912, %v95_v60 }
  0x29   :  { %v97_v62 = vshrl.u32 %v96_v61, 30 }
  0x2b   :  { %v98_v63 = vshll.u32 %v97_v62, 30  ;;  %v121_v19 = vsub.s32 4, %v97_v62 }
  0x2d   :  { %v99_v0 = vsub.s32 %v95_v60, %v98_v63  ;;  %v122_v22 = vsel %vm37_vm7, %v121_v19, %v97_v62 }
  0x2e   :  { %v124_v25 = vsel %vm36_vm8, 0, %v122_v22 }
  0x2f   :  { %v101_v1 = vsub.s32 0, %v99_v0  ;;  %v232_v26 = vadd.s32 3, %v124_v25  ;;  %v128_v27 = vand.u32 3, %v124_v25 }
  0x31   :  { %v255_v2 = vmin.u32 %v101_v1, %v99_v0  ;;  %v233_v28 = vand.u32 3, %v232_v26  ;;  %vm133_vm9 = vcmp.eq.s32.totalorder %v128_v27, 2  ;;  %vm130_vm11 = vcmp.eq.s32.totalorder %v128_v27, 0 }
  0x32   :  { %vm129_vm13 = vcmp.lt.s32.totalorder %v128_v27, 2 }
  0x33   :  { %v103_v3 = vclz %v255_v2  ;;  %vm238_vm10 = vcmp.eq.s32.totalorder %v233_v28, 2  ;;  %vm235_vm12 = vcmp.eq.s32.totalorder %v233_v28, 0  ;;  %vm234_vm14 = vcmp.lt.s32.totalorder %v233_v28, 2 }
  0x35   :  { %v256_v4 = vadd.s32 4294967294, %v103_v3 }
  0x37   :  { %vm257_vm6 = vcmp.lt.s32.totalorder %v256_v4, 0 }
  0x38   :  { %v106_v7 = vsel %vm257_vm6, 0, %v256_v4 }
  0x39   :  { %v107_v8 = vsub.s32 32, %v106_v7  ;;  %v108_v10 = vshll.u32 %v99_v0, %v106_v7  ;;  %v111_v11 = vsub.s32 4294967266, %v106_v7 }
  0x3b   :  { %v109_v12 = vshrl.u32 %v91_v5, %v107_v8  ;;  %v112_v13 = vadd.s32 127, %v111_v11 }
  0x3d   :  { %v110_v14 = vor.u32 %v109_v12, %v108_v10  ;;  %v113_v15 = vshll.u32 %v112_v13, 23 }
  0x3f   :  { %v114_v16 = vor.u32 4788187, %v113_v15  ;;  %v117_v17 = vcvt.s32.f32 %v110_v14 }
  0x41   :  { %v115_v18 = vand.u32 2147483647, %v114_v16 }
  0x43   :  { %v118_v20 = vmul.f32 %v117_v17, %v115_v18 }
  0x45   :  { %v119_v21 = vxor.u32 2147483648, %v118_v20 }
  0x47   :  { %v120_v23 = vsel %vm37_vm7, %v119_v21, %v118_v20 }
  0x48   :  { %v123_v24 = vsel %vm36_vm8, %v308_v6, %v120_v23 }
  0x49   :  { %272 = vcosq.f32 %v123_v24 }
  0x4a   :  { %274 = vsinq.f32 %v123_v24 }
  0x53   :  { %v273_v29 = vpop.eup %272 }
  0x54   :  { %v275_v30 = vpop.eup %274  ;;  %v134_v31 = vxor.u32 2147483648, %v273_v29 }
  0x55   :  { %v131_v9 = vxor.u32 2147483648, %v275_v30 }
  0x56   :  { %v135_v32 = vsel %vm133_vm9, %v134_v31, %v275_v30  ;;  %v240_v33 = vsel %vm238_vm10, %v134_v31, %v275_v30 }
  0x57   :  { %v132_v34 = vsel %vm130_vm11, %v273_v29, %v131_v9  ;;  %v237_v35 = vsel %vm235_vm12, %v273_v29, %v131_v9 }
  0x58   :  { %v136_v36 = vsel %vm129_vm13, %v132_v34, %v135_v32  ;;  %v241_v37 = vsel %vm234_vm14, %v237_v35, %v240_v33 }
  0x59   :  { %v137_v38 = vsel %vm127_vm15, nan, %v136_v36  ;;  %v242_v39 = vsel %vm127_vm15, nan, %v241_v37 }
  0x5a   :  { %138 = vst [vmem:[%s337_s2] sm:$0xf] %v137_v38  ;;  %243 = vst [vmem:[%s338_s3] sm:$0xf] %v242_v39 }

</bundles_post_ra>
